<compile_context>
chip_gen: v7x
topology: tpu7x:2x2x1
jax: 0.10.0
libtpu: 0.0.40
codegen_flags: <defaults>
</compile_context>

<pallas_src>
import functools

import jax
import jax.numpy as jnp
from jax.experimental import pallas as pl
from jax.experimental.pallas import tpu as pltpu

_EPS = 1e-5
_LANE = 128
_SUB = 8                  # f32 sublane tile
_TM_MAX = 2048            # rows per grid step -> 1 MiB of f32 per input block
_NUM_SPLITS = 2           # "parallel" reduction splits (v7x has 2 TensorCores)


def _cdiv(a, b):
    return -(-a // b)


def _dice_kernel(x_ref, t_ref, out_ref, *, logits, rows, block_rows, kk,
                 needs_mask):
    """Grid = (n_batch, splits, k).

    Accumulates partial sums of (x*t, x, t) into the resident (3, 8, 128)
    output block; the final lane/sublane reduction and the dice formula are
    computed in the (tiny) JAX wrapper.
    """
    k = pl.program_id(2)

    @pl.when(k == 0)
    def _():
        out_ref[...] = jnp.zeros_like(out_ref)

    x = x_ref[...].astype(jnp.float32)          # (block_rows, 128)
    if logits:
        x = jax.nn.sigmoid(x)
    t = t_ref[...].astype(jnp.float32)          # (block_rows, 128)

    if needs_mask:
        # Unclamped global row-block index (the index_map clamps the DMA to
        # stay in bounds; here we zero out any rows past the valid range).
        g = pl.program_id(1) * kk + k
        row_ids = g * block_rows + jax.lax.broadcasted_iota(
            jnp.int32, (block_rows, _LANE), 0)
        valid = row_ids < rows
        x = jnp.where(valid, x, 0.0)
        t = jnp.where(valid, t, 0.0)

    groups = block_rows // _SUB
    # Reduce the tile to one (8, 128) vreg per quantity with VPU adds, then
    # accumulate into the VMEM-resident output block.
    out_ref[0] += (x * t).reshape(groups, _SUB, _LANE).sum(axis=0)
    out_ref[1] += x.reshape(groups, _SUB, _LANE).sum(axis=0)
    out_ref[2] += t.reshape(groups, _SUB, _LANE).sum(axis=0)


def soft_dice_loss_pallas(outputs, targets, *, per_image=False, logits=False):
    """Matches soft_dice_loss(outputs, targets, per_image) from the PyTorch
    module. If logits=True, sigmoid is applied inside the kernel
    (TorchDiceLoss.logits). The `weight` buffer / `size_average` flag are
    unused in the PyTorch forward and are therefore omitted.
    """
    n_batch = outputs.shape[0] if per_image else 1
    x = outputs.reshape(n_batch, -1)
    t = targets.reshape(n_batch, -1)
    n = x.shape[1]

    # Only pad when n is ragged w.r.t. a single (8, 128) vreg tile (rare).
    # Larger-block tails are handled by in-kernel masking, not padding, so the
    # common path never materializes an extra copy of the inputs in HBM.
    chunk = _SUB * _LANE
    pad = (-n) % chunk
    if pad:
        x_pad = -1e30 if logits else 0.0        # sigmoid(-1e30) == 0 in f32
        x = jnp.pad(x, ((0, 0), (0, pad)), constant_values=x_pad)
        t = jnp.pad(t, ((0, 0), (0, pad)), constant_values=0.0)
    rows = (n + pad) // _LANE                   # multiple of 8 by construction

    x = x.reshape(n_batch, rows, _LANE)
    t = t.reshape(n_batch, rows, _LANE)

    block_rows = min(_TM_MAX, rows)             # rows and _TM_MAX are mult. of 8
    nblk = _cdiv(rows, block_rows)              # row-blocks along the reduction
    splits = _NUM_SPLITS if nblk >= _NUM_SPLITS else 1
    kk = _cdiv(nblk, splits)                    # row-blocks handled per split
    needs_mask = (splits * kk * block_rows) != rows

    def in_map(b, s, k):
        g = s * kk + k
        if needs_mask:
            # Keep the DMA in-bounds; the kernel masks the overrun rows.
            g = jnp.minimum(g, nblk - 1)
        return (b, g, 0)

    kernel = functools.partial(
        _dice_kernel, logits=logits, rows=rows, block_rows=block_rows,
        kk=kk, needs_mask=needs_mask)

    out = pl.pallas_call(
        kernel,
        out_shape=jax.ShapeDtypeStruct((n_batch, splits, 3, _SUB, _LANE),
                                       jnp.float32),
        grid_spec=pltpu.PrefetchScalarGridSpec(
            num_scalar_prefetch=0,
            grid=(n_batch, splits, kk),
            in_specs=[
                pl.BlockSpec((None, block_rows, _LANE), in_map),
                pl.BlockSpec((None, block_rows, _LANE), in_map),
            ],
            out_specs=pl.BlockSpec((None, None, 3, _SUB, _LANE),
                                   lambda b, s, k: (b, s, 0, 0, 0)),
        ),
        compiler_params=pltpu.CompilerParams(
            dimension_semantics=("parallel", "parallel", "arbitrary"),
            vmem_limit_bytes=32 << 20),
    )(x, t)

    # Tiny recombine of the per-(batch, split) partial sums in plain JAX.
    sums = jnp.sum(out, axis=(1, 3, 4))         # (n_batch, 3)
    intersection = sums[:, 0]
    union = sums[:, 1] + sums[:, 2] + _EPS
    loss = 1.0 - (2.0 * intersection + _EPS) / union
    return jnp.mean(loss)


def _reference_soft_dice(outputs, targets, per_image=False, logits=False):
    if logits:
        outputs = jax.nn.sigmoid(outputs)
    b = outputs.shape[0] if per_image else 1
    o = outputs.reshape(b, -1).astype(jnp.float32)
    t = targets.reshape(b, -1).astype(jnp.float32)
    inter = jnp.sum(o * t, axis=1)
    union = jnp.sum(o, axis=1) + jnp.sum(t, axis=1) + _EPS
    return jnp.mean(1.0 - (2.0 * inter + _EPS) / union)


if __name__ == "__main__":
    key = jax.random.PRNGKey(0)
    k1, k2 = jax.random.split(key)

    # TorchDiceLoss defaults: per_image=False, logits=False (weight buffer is
    # unused in forward). Inputs: NCHW probabilities and binary targets.
    x = jax.random.uniform(k1, (2, 4, 16, 16), dtype=jnp.float32)
    tgt = (jax.random.uniform(k2, (2, 4, 16, 16)) > 0.5).astype(jnp.float32)

    loss = soft_dice_loss_pallas(x, tgt, per_image=False, logits=False)
    loss = jax.block_until_ready(loss)
    ref = _reference_soft_dice(x, tgt, per_image=False, logits=False)
    assert abs(float(loss) - float(ref)) < 1e-5, (float(loss), float(ref))

    # Also exercise the per_image / logits configuration.
    loss2 = soft_dice_loss_pallas(x * 4.0 - 2.0, tgt, per_image=True,
                                  logits=True)
    loss2 = jax.block_until_ready(loss2)
    ref2 = _reference_soft_dice(x * 4.0 - 2.0, tgt, per_image=True,
                                logits=True)
    assert abs(float(loss2) - float(ref2)) < 1e-5, (float(loss2), float(ref2))

    print("KERNEL_OK")
</pallas_src>

<mosaic_0001>
module attributes {stable_mosaic.version = 11 : i64} {
  func.func @_dice_kernel(%arg0: i32, %arg1: i32, %arg2: i32, %arg3: memref<1x16x128xf32, #tpu.memory_space<vmem>>, %arg4: memref<1x16x128xf32, #tpu.memory_space<vmem>>, %arg5: memref<1x1x3x8x128xf32, #tpu.memory_space<vmem>>) attributes {dimension_semantics = [#tpu.dimension_semantics<parallel>, #tpu.dimension_semantics<parallel>, #tpu.dimension_semantics<arbitrary>], iteration_bounds = array<i64: 1, 1, 1>, scalar_prefetch = 0 : i64, scratch_operands = 0 : i64, tpu.core_type = #tpu.core_type<tc>, window_params = [{transform_indices = @transform_0, window_bounds = array<i64: 1, 16, 128>}, {transform_indices = @transform_1, window_bounds = array<i64: 1, 16, 128>}, {transform_indices = @transform_2, window_bounds = array<i64: 1, 1, 3, 8, 128>}]} {
    %c0_i32 = arith.constant 0 : i32
    %0 = arith.cmpi eq, %arg2, %c0_i32 : i32
    %1 = arith.extui %0 : i1 to i32
    %c0_i32_0 = arith.constant 0 : i32
    %2 = arith.cmpi ne, %1, %c0_i32_0 : i32
    scf.if %2 {
      %cst_36 = arith.constant 0.000000e+00 : f32
      %32 = vector.broadcast %cst_36 : f32 to vector<3x8x128xf32>
      %c0_37 = arith.constant 0 : index
      %c0_38 = arith.constant 0 : index
      %c0_39 = arith.constant 0 : index
      %c0_40 = arith.constant 0 : index
      %c0_41 = arith.constant 0 : index
      %33 = vector.load %arg5[%c0_37, %c0_38, %c0_39, %c0_40, %c0_41] : memref<1x1x3x8x128xf32, #tpu.memory_space<vmem>>, vector<1x1x3x8x128xf32>
      %34 = vector.shape_cast %33 : vector<1x1x3x8x128xf32> to vector<3x8x128xf32>
      %35 = vector.shape_cast %32 : vector<3x8x128xf32> to vector<1x1x3x8x128xf32>
      tpu.vector_store %arg5[%c0_37, %c0_38, %c0_39, %c0_40, %c0_41], %35 {strides = array<i32>} : memref<1x1x3x8x128xf32, #tpu.memory_space<vmem>>, vector<1x1x3x8x128xf32>,
    } else {
    }
    %c0 = arith.constant 0 : index
    %c0_1 = arith.constant 0 : index
    %c0_2 = arith.constant 0 : index
    %3 = vector.load %arg3[%c0, %c0_1, %c0_2] : memref<1x16x128xf32, #tpu.memory_space<vmem>>, vector<1x16x128xf32>
    %4 = vector.shape_cast %3 : vector<1x16x128xf32> to vector<16x128xf32>
    %c0_3 = arith.constant 0 : index
    %c0_4 = arith.constant 0 : index
    %c0_5 = arith.constant 0 : index
    %5 = vector.load %arg4[%c0_3, %c0_4, %c0_5] : memref<1x16x128xf32, #tpu.memory_space<vmem>>, vector<1x16x128xf32>
    %6 = vector.shape_cast %5 : vector<1x16x128xf32> to vector<16x128xf32>
    %c0_6 = arith.constant 0 : index
    %c0_7 = arith.constant 0 : index
    %c0_8 = arith.constant 0 : index
    %c0_9 = arith.constant 0 : index
    %c0_10 = arith.constant 0 : index
    %7 = vector.load %arg5[%c0_6, %c0_7, %c0_8, %c0_9, %c0_10] : memref<1x1x3x8x128xf32, #tpu.memory_space<vmem>>, vector<1x1x1x8x128xf32>
    %8 = vector.shape_cast %7 : vector<1x1x1x8x128xf32> to vector<8x128xf32>
    %9 = arith.mulf %4, %6 : vector<16x128xf32>
    %10 = vector.shape_cast %9 : vector<16x128xf32> to vector<2x8x128xf32>
    %cst = arith.constant dense<0.000000e+00> : vector<8x128xf32>
    %11 = vector.multi_reduction <add>, %10, %cst [0] : vector<2x8x128xf32> to vector<8x128xf32>
    %12 = arith.addf %8, %11 : vector<8x128xf32>
    %c0_11 = arith.constant 0 : index
    %c0_12 = arith.constant 0 : index
    %c0_13 = arith.constant 0 : index
    %c0_14 = arith.constant 0 : index
    %c0_15 = arith.constant 0 : index
    %13 = vector.load %arg5[%c0_11, %c0_12, %c0_13, %c0_14, %c0_15] : memref<1x1x3x8x128xf32, #tpu.memory_space<vmem>>, vector<1x1x1x8x128xf32>
    %14 = vector.shape_cast %13 : vector<1x1x1x8x128xf32> to vector<8x128xf32>
    %15 = vector.shape_cast %12 : vector<8x128xf32> to vector<1x1x1x8x128xf32>
    tpu.vector_store %arg5[%c0_11, %c0_12, %c0_13, %c0_14, %c0_15], %15 {strides = array<i32>} : memref<1x1x3x8x128xf32, #tpu.memory_space<vmem>>, vector<1x1x1x8x128xf32>,
    %c0_16 = arith.constant 0 : index
    %c0_17 = arith.constant 0 : index
    %c1 = arith.constant 1 : index
    %c0_18 = arith.constant 0 : index
    %c0_19 = arith.constant 0 : index
    %16 = vector.load %arg5[%c0_16, %c0_17, %c1, %c0_18, %c0_19] : memref<1x1x3x8x128xf32, #tpu.memory_space<vmem>>, vector<1x1x1x8x128xf32>
    %17 = vector.shape_cast %16 : vector<1x1x1x8x128xf32> to vector<8x128xf32>
    %18 = vector.shape_cast %4 : vector<16x128xf32> to vector<2x8x128xf32>
    %cst_20 = arith.constant dense<0.000000e+00> : vector<8x128xf32>
    %19 = vector.multi_reduction <add>, %18, %cst_20 [0] : vector<2x8x128xf32> to vector<8x128xf32>
    %20 = arith.addf %17, %19 : vector<8x128xf32>
    %c0_21 = arith.constant 0 : index
    %c0_22 = arith.constant 0 : index
    %c1_23 = arith.constant 1 : index
    %c0_24 = arith.constant 0 : index
    %c0_25 = arith.constant 0 : index
    %21 = vector.load %arg5[%c0_21, %c0_22, %c1_23, %c0_24, %c0_25] : memref<1x1x3x8x128xf32, #tpu.memory_space<vmem>>, vector<1x1x1x8x128xf32>
    %22 = vector.shape_cast %21 : vector<1x1x1x8x128xf32> to vector<8x128xf32>
    %23 = vector.shape_cast %20 : vector<8x128xf32> to vector<1x1x1x8x128xf32>
    tpu.vector_store %arg5[%c0_21, %c0_22, %c1_23, %c0_24, %c0_25], %23 {strides = array<i32>} : memref<1x1x3x8x128xf32, #tpu.memory_space<vmem>>, vector<1x1x1x8x128xf32>,
    %c0_26 = arith.constant 0 : index
    %c0_27 = arith.constant 0 : index
    %c2 = arith.constant 2 : index
    %c0_28 = arith.constant 0 : index
    %c0_29 = arith.constant 0 : index
    %24 = vector.load %arg5[%c0_26, %c0_27, %c2, %c0_28, %c0_29] : memref<1x1x3x8x128xf32, #tpu.memory_space<vmem>>, vector<1x1x1x8x128xf32>
    %25 = vector.shape_cast %24 : vector<1x1x1x8x128xf32> to vector<8x128xf32>
    %26 = vector.shape_cast %6 : vector<16x128xf32> to vector<2x8x128xf32>
    %cst_30 = arith.constant dense<0.000000e+00> : vector<8x128xf32>
    %27 = vector.multi_reduction <add>, %26, %cst_30 [0] : vector<2x8x128xf32> to vector<8x128xf32>
    %28 = arith.addf %25, %27 : vector<8x128xf32>
    %c0_31 = arith.constant 0 : index
    %c0_32 = arith.constant 0 : index
    %c2_33 = arith.constant 2 : index
    %c0_34 = arith.constant 0 : index
    %c0_35 = arith.constant 0 : index
    %29 = vector.load %arg5[%c0_31, %c0_32, %c2_33, %c0_34, %c0_35] : memref<1x1x3x8x128xf32, #tpu.memory_space<vmem>>, vector<1x1x1x8x128xf32>
    %30 = vector.shape_cast %29 : vector<1x1x1x8x128xf32> to vector<8x128xf32>
    %31 = vector.shape_cast %28 : vector<8x128xf32> to vector<1x1x1x8x128xf32>
    tpu.vector_store %arg5[%c0_31, %c0_32, %c2_33, %c0_34, %c0_35], %31 {strides = array<i32>} : memref<1x1x3x8x128xf32, #tpu.memory_space<vmem>>, vector<1x1x1x8x128xf32>,
    return
  }
  func.func @transform_0(%arg0: i32, %arg1: i32, %arg2: i32) -> (i32, i32, i32) {
    %c1_i32 = arith.constant 1 : i32
    %0 = arith.muli %arg1, %c1_i32 : i32
    %1 = arith.addi %0, %arg2 : i32
    %c0_i32 = arith.constant 0 : i32
    %c0_i32_0 = arith.constant 0 : i32
    return %arg0, %1, %c0_i32 : i32, i32, i32
  }
  func.func @transform_1(%arg0: i32, %arg1: i32, %arg2: i32) -> (i32, i32, i32) {
    %c1_i32 = arith.constant 1 : i32
    %0 = arith.muli %arg1, %c1_i32 : i32
    %1 = arith.addi %0, %arg2 : i32
    %c0_i32 = arith.constant 0 : i32
    %c0_i32_0 = arith.constant 0 : i32
    return %arg0, %1, %c0_i32 : i32, i32, i32
  }
  func.func @transform_2(%arg0: i32, %arg1: i32, %arg2: i32) -> (i32, i32, i32, i32, i32) {
    %c0_i32 = arith.constant 0 : i32
    %c0_i32_0 = arith.constant 0 : i32
    %c0_i32_1 = arith.constant 0 : i32
    %c0_i32_2 = arith.constant 0 : i32
    return %arg0, %arg1, %c0_i32, %c0_i32_0, %c0_i32_1 : i32, i32, i32, i32, i32
  }
}

</mosaic_0001>

<bundles_post_ra>
// kernel: tpu_custom_call.1
= control target key start
LH: loop header
LB: loop body
LE: loop exit
PB: predicated region body
PF: predicated region fallthrough
CT: control target
= control target key end

     0   :  { %7 = vsyncpa [#allocation3], 0  ;;  %s240_s0 = inlined_call_operand.hbm [shape: f32[1,16,128], index: 0, kind: input, shape index: {}]   ;;  %s241_s1 = inlined_call_operand.hbm [shape: f32[1,16,128], index: 1, kind: input, shape index: {}]   ;;  %s242_s2 = inlined_call_operand.hbm [shape: f32[1,1,3,8,128], index: 2, kind: output, shape index: {}]  }
   0x1   :  { %8 = vsyncpa [#allocation6], 0 }
   0x2   :  { %9 = vsyncpa [#allocation4], 0  ;;  %s175_s9 = smov [#allocation2]   ;;  %s103_s13 = scalar_lea.hbm %s240_s0, 256 }
   0x3   :  { %s19_s10 = sshll.u32 %s175_s9, 4  ;;  %p104_p0 = scmp.ne.s32.totalorder %s240_s0, %s103_s13  ;;  %s20_s10 = int_to_ptr.vmem [resolvable:$true] %s19_s10 }
   0x4   :  { %p107_p1 = scmp.lt.u32.totalorder %s103_s13, %s240_s0 }
   0x6   :  { %p109_p2 = pnand %p107_p1, %p104_p0 }
   0x8   :  { %112 = shalt.err (!%p109_p2)
}
   0x9   :  { %s113_s18 = scalar_lea.vmem %s20_s10, 256  ;;  %p118_p4 = scmp.lt.s32.totalorder %s20_s10, %s20_s10 }
   0xa   :  { %p114_p3 = scmp.ne.s32.totalorder %s20_s10, %s113_s18  ;;  %p119_p5 = scmp.lt.s32.totalorder %s113_s18, %s113_s18 }
   0xc   :  { %p120_p6 = por %p119_p5, %p118_p4 }
   0xe   :  { %p121_p7 = pnand %p120_p6, %p114_p3 }
  0x10   :  { %124 = shalt.err (!%p121_p7)
}
  0x11   :  { %s176_s19 = smov 128   ;;  %s177_s20 = smov 8  }
  0x12   :  { %25 = dma.hbm_to_vmem [thread:$0]  %s240_s0, 256, %s20_s10, [#allocation3], %s176_s19, %s176_s19, %s177_s20  }
  0x13   :  { %s178_s23 = smov [#allocation5]   ;;  %s125_s27 = scalar_lea.hbm %s241_s1, 256 }
  0x14   :  { %s35_s24 = sshll.u32 %s178_s23, 4  ;;  %p126_p8 = scmp.ne.s32.totalorder %s241_s1, %s125_s27  ;;  %s36_s24 = int_to_ptr.vmem [resolvable:$true] %s35_s24 }
  0x15   :  { %p129_p9 = scmp.lt.u32.totalorder %s125_s27, %s241_s1 }
  0x17   :  { %p131_p10 = pnand %p129_p9, %p126_p8 }
  0x19   :  { %134 = shalt.err (!%p131_p10)
}
  0x1a   :  { %s135_s4 = scalar_lea.vmem %s36_s24, 256  ;;  %p140_p12 = scmp.lt.s32.totalorder %s36_s24, %s36_s24 }
  0x1b   :  { %p136_p11 = scmp.ne.s32.totalorder %s36_s24, %s135_s4  ;;  %p141_p13 = scmp.lt.s32.totalorder %s135_s4, %s135_s4 }
  0x1d   :  { %p142_p0 = por %p141_p13, %p140_p12 }
  0x1f   :  { %p143_p1 = pnand %p142_p0, %p136_p11 }
  0x21   :  { %146 = shalt.err (!%p143_p1)
}
  0x22   :  { %41 = dma.hbm_to_vmem [thread:$0]  %s241_s1, 256, %s36_s24, [#allocation6], %s176_s19, %s176_s19, %s177_s20  }
  0x23   :  { %169 = dma.done.wait [#allocation3], 256  }
  0x24   :  { %170 = vsyncadd [#allocation3], 4294967040 }
  0x25   :  { %171 = dma.done.wait [#allocation6], 256  }
  0x26   :  { %172 = vsyncadd [#allocation6], 4294967040  ;;  %v59_v0 = vld [vmem:[#allocation2] sm:$0xff]  ;;  %v60_v1 = vld [vmem:[#allocation2 + $0x8] sm:$0xff]  ;;  %s179_s6 = smov [#allocation7]  }
  0x27   :  { %v61_v2 = vld [vmem:[#allocation5] sm:$0xff]  ;;  %v62_v3 = vld [vmem:[#allocation5 + $0x8] sm:$0xff]  ;;  %v71_v5 = vadd.f32 %v60_v1, %v59_v0  ;;  %s84_s7 = sshll.u32 %s179_s6, 4  ;;  %s85_s7 = int_to_ptr.vmem [resolvable:$true] %s84_s7 }
  0x28   :  { %v64_v4 = vmul.f32 %v61_v2, %v59_v0  ;;  %v65_v6 = vmul.f32 %v62_v3, %v60_v1  ;;  %v76_v7 = vadd.f32 %v62_v3, %v61_v2  ;;  %s147_s1 = scalar_lea.vmem %s85_s7, 384  ;;  %p152_p3 = scmp.lt.s32.totalorder %s85_s7, %s85_s7 }
  0x29   :  { %73 = vst [vmem:[#allocation7 + $0x8] sm:$0xff] %v71_v5  ;;  %p148_p2 = scmp.ne.s32.totalorder %s85_s7, %s147_s1  ;;  %p153_p4 = scmp.lt.s32.totalorder %s147_s1, %s147_s1 }
  0x2a   :  { %v66_v8 = vadd.f32 %v65_v6, %v64_v4  ;;  %78 = vst [vmem:[#allocation7 + $0x10] sm:$0xff] %v76_v7 }
  0x2b   :  { %p154_p5 = por %p153_p4, %p152_p3 }
  0x2c   :  { %68 = vst [vmem:[#allocation7] sm:$0xff] %v66_v8 }
  0x2d   :  { %p155_p6 = pnand %p154_p5, %p148_p2 }
  0x2f   :  { %158 = shalt.err (!%p155_p6)
}
  0x30   :  { %s159_s10 = scalar_lea.hbm %s242_s2, 384 }
  0x31   :  { %p160_p7 = scmp.ne.s32.totalorder %s242_s2, %s159_s10  ;;  %p163_p8 = scmp.lt.u32.totalorder %s159_s10, %s242_s2 }
  0x33   :  { %p165_p9 = pnand %p163_p8, %p160_p7 }
  0x35   :  { %168 = shalt.err (!%p165_p9)
}
  0x36   :  { %90 = dma.vmem_to_hbm [thread:$0]  %s85_s7, 384, %s242_s2, [#allocation4], %s176_s19, %s176_s19, %s177_s20  }
  0x37   :  { %173 = dma.done.wait [#allocation4], 384  }
  0x38   :  { %174 = vsyncadd [#allocation4], 4294966912 }
  0x39   :  { %94 = vsyncpa [#allocation3], 1 }
  0x3a   :  { %95 = vsyncpa [#allocation6], 1 }
  0x3b   :  { %96 = vsyncpa [#allocation4], 1 }

</bundles_post_ra>
